<compile_context>
chip_gen: v6e
topology: v6e:2x2x1
jax: 0.10.0
libtpu: 0.0.40
codegen_flags: <defaults>
</compile_context>

<pallas_src>
import numpy as np
import jax
import jax.numpy as jnp
from jax.experimental import pallas as pl
from jax.experimental.pallas import tpu as pltpu

LATENT_DIM = 64   # Cout of the 1x1 conv
HIDDEN = 32       # Cout of the 4x4 stride-2 conv
K = 4
STRIDE = 2
PAD = 1


def _round_up(x, m):
    return ((x + m - 1) // m) * m


def _encoder_kernel(p_ref, w1_ref, b1_ref, w2_ref, b2_ref, o_ref):
    # p_ref : (16, tile_m)  im2col patches of ONE image tile, pixels on lanes
    # w1_ref: (32, 16)      Conv2d(1,32,4,s=2,p=1) weights (flattened)
    # b1_ref: (32, 1)
    # w2_ref: (64, 32)      Conv2d(32,64,1) weights
    # b2_ref: (64, 1)
    # o_ref : (64, tile_m)  lane-dense NCHW output slab for this image tile
    h = jnp.dot(w1_ref[...], p_ref[...], preferred_element_type=jnp.float32)
    h = jnp.maximum(h + b1_ref[...], 0.0)
    y = jnp.dot(w2_ref[...], h, preferred_element_type=jnp.float32)
    o_ref[...] = (y + b2_ref[...]).astype(o_ref.dtype)


def encoder_forward(x, w1, b1, w2, b2, *, tile_m=1024):
    """x: (N, 1, H, W) f32 -> (N, LATENT_DIM, H//2, W//2) f32."""
    N, Cin, H, W = x.shape
    assert Cin == 1 and H % STRIDE == 0 and W % STRIDE == 0
    OH, OW = H // STRIDE, W // STRIDE
    Cmid = w1.shape[0]                 # 32
    Cout = w2.shape[0]                 # 64
    Kdim = Cin * K * K                 # 16
    Mimg = OH * OW                     # pixels per image

    # ---- im2col via space-to-depth: one reshape+transpose, then contiguous slices
    xp = jnp.pad(x[:, 0].astype(jnp.float32), ((0, 0), (PAD, PAD), (PAD, PAD)))
    Hp, Wp = H + 2 * PAD, W + 2 * PAD                      # both even
    # xsd[pr, pc, n, a, b] = xp[n, 2a+pr, 2b+pc]
    xsd = xp.reshape(N, Hp // 2, 2, Wp // 2, 2).transpose(2, 4, 0, 1, 3)
    cols = []
    for ky in range(K):
        for kx in range(K):
            pr, ar = ky % 2, ky // 2
            pc, ac = kx % 2, kx // 2
            cols.append(xsd[pr, pc, :, ar:ar + OH, ac:ac + OW])   # (N, OH, OW)
    # Pt[n, ky*K+kx, oy*OW+ox] = xp[n, 2*oy+ky, 2*ox+kx]
    Pt = jnp.stack(cols, axis=1).reshape(N, Kdim, Mimg)

    # ---- tiling: large lane-dense tiles that never cross an image boundary
    tile_m = max(128, (min(tile_m, _round_up(Mimg, 128)) // 128) * 128)
    if N * pl.cdiv(Mimg, tile_m) < 2:          # keep both v7x TCs busy if we can
        tile_m = max(128, _round_up(pl.cdiv(Mimg, 2), 128))
    tiles_per_image = pl.cdiv(Mimg, tile_m)
    Mimg_p = tiles_per_image * tile_m
    if Mimg_p != Mimg:
        Pt = jnp.pad(Pt, ((0, 0), (0, 0), (0, Mimg_p - Mimg)))

    # ---- weights in matmul form
    W1m = w1.reshape(Cmid, Kdim).astype(jnp.float32)   # (32, 16)
    b1c = b1.reshape(Cmid, 1).astype(jnp.float32)
    W2m = w2.reshape(Cout, Cmid).astype(jnp.float32)   # (64, 32)
    b2c = b2.reshape(Cout, 1).astype(jnp.float32)

    flops = 2 * N * Mimg_p * (Kdim * Cmid + Cmid * Cout)
    bytes_accessed = 4 * (N * Kdim * Mimg_p + N * Cout * Mimg_p
                          + Cmid * Kdim + Cmid + Cout * Cmid + Cout)

    out = pl.pallas_call(
        _encoder_kernel,
        out_shape=jax.ShapeDtypeStruct((N, Cout, Mimg_p), jnp.float32),
        grid=(N, tiles_per_image),
        in_specs=[
            pl.BlockSpec((None, Kdim, tile_m), lambda n, t: (n, 0, t)),  # Pt tile
            pl.BlockSpec((Cmid, Kdim), lambda n, t: (0, 0)),             # W1 (const)
            pl.BlockSpec((Cmid, 1), lambda n, t: (0, 0)),                # b1 (const)
            pl.BlockSpec((Cout, Cmid), lambda n, t: (0, 0)),             # W2 (const)
            pl.BlockSpec((Cout, 1), lambda n, t: (0, 0)),                # b2 (const)
        ],
        out_specs=pl.BlockSpec((None, Cout, tile_m), lambda n, t: (n, 0, t)),
        compiler_params=pltpu.CompilerParams(
            dimension_semantics=("parallel", "parallel")),
        cost_estimate=pl.CostEstimate(
            flops=flops, transcendentals=0, bytes_accessed=bytes_accessed),
    )(Pt, W1m, b1c, W2m, b2c)

    # Output is already NCHW-ordered; only drop per-image padding + reshape.
    if Mimg_p != Mimg:
        out = out[:, :, :Mimg]
    return out.reshape(N, Cout, OH, OW)


def torch_style_reference(x, w1, b1, w2, b2):
    """Direct float64 implementation of the PyTorch Encoder semantics."""
    x = np.asarray(x, np.float64)
    w1 = np.asarray(w1, np.float64)
    b1 = np.asarray(b1, np.float64)
    w2 = np.asarray(w2, np.float64)
    b2 = np.asarray(b2, np.float64)
    N, Cin, H, W = x.shape
    Cmid = w1.shape[0]
    OH, OW = H // STRIDE, W // STRIDE
    xp = np.pad(x, ((0, 0), (0, 0), (PAD, PAD), (PAD, PAD)))
    y = np.zeros((N, Cmid, OH, OW))
    for ky in range(K):
        for kx in range(K):
            patch = xp[:, :, ky:ky + STRIDE * OH:STRIDE,
                             kx:kx + STRIDE * OW:STRIDE]        # (N, Cin, OH, OW)
            y += np.einsum('nchw,dc->ndhw', patch, w1[:, :, ky, kx])
    h = np.maximum(y + b1[None, :, None, None], 0.0)
    z = np.einsum('nchw,dc->ndhw', h, w2[:, :, 0, 0]) + b2[None, :, None, None]
    return z


if __name__ == "__main__":
    key = jax.random.PRNGKey(0)
    k1, k2, k3, k4, k5 = jax.random.split(key, 5)
    N, H, W = 2, 16, 16
    x = jax.random.normal(k1, (N, 1, H, W), jnp.float32)
    # Conv2d(1, 32, 4, stride=2, padding=1): weight (32, 1, 4, 4), bias (32,)
    w1 = jax.random.normal(k2, (HIDDEN, 1, K, K), jnp.float32) * 0.1
    b1 = jax.random.normal(k3, (HIDDEN,), jnp.float32) * 0.1
    # Conv2d(32, LATENT_DIM, 1): weight (64, 32, 1, 1), bias (64,)
    w2 = jax.random.normal(k4, (LATENT_DIM, HIDDEN, 1, 1), jnp.float32) * 0.1
    b2 = jax.random.normal(k5, (LATENT_DIM,), jnp.float32) * 0.1

    out = jax.jit(encoder_forward)(x, w1, b1, w2, b2)
    out = jax.block_until_ready(out)
    assert out.shape == (N, LATENT_DIM, H // STRIDE, W // STRIDE)

    ref = torch_style_reference(x, w1, b1, w2, b2)
    np.testing.assert_allclose(np.asarray(out), ref, rtol=2e-4, atol=2e-4)
    print("KERNEL_OK")
</pallas_src>

<mosaic_0001>
module attributes {stable_mosaic.version = 11 : i64} {
  func.func @_encoder_kernel(%arg0: i32, %arg1: i32, %arg2: memref<1x16x128xf32, #tpu.memory_space<vmem>>, %arg3: memref<32x16xf32, #tpu.memory_space<vmem>>, %arg4: memref<32x1xf32, #tpu.memory_space<vmem>>, %arg5: memref<64x32xf32, #tpu.memory_space<vmem>>, %arg6: memref<64x1xf32, #tpu.memory_space<vmem>>, %arg7: memref<1x64x128xf32, #tpu.memory_space<vmem>>) attributes {dimension_semantics = [#tpu.dimension_semantics<parallel>, #tpu.dimension_semantics<parallel>], iteration_bounds = array<i64: 2, 1>, scalar_prefetch = 0 : i64, scratch_operands = 0 : i64, tpu.core_type = #tpu.core_type<tc>, window_params = [{transform_indices = @transform_0, window_bounds = array<i64: 1, 16, 128>}, {pipeline_mode = #tpu.pipeline_mode<synchronous>, transform_indices = @transform_1, window_bounds = array<i64: 32, 16>}, {pipeline_mode = #tpu.pipeline_mode<synchronous>, transform_indices = @transform_2, window_bounds = array<i64: 32, 1>}, {pipeline_mode = #tpu.pipeline_mode<synchronous>, transform_indices = @transform_3, window_bounds = array<i64: 64, 32>}, {pipeline_mode = #tpu.pipeline_mode<synchronous>, transform_indices = @transform_4, window_bounds = array<i64: 64, 1>}, {transform_indices = @transform_5, window_bounds = array<i64: 1, 64, 128>}]} {
    %c0 = arith.constant 0 : index
    %c0_0 = arith.constant 0 : index
    %0 = vector.load %arg3[%c0, %c0_0] : memref<32x16xf32, #tpu.memory_space<vmem>>, vector<32x16xf32>
    %c0_1 = arith.constant 0 : index
    %c0_2 = arith.constant 0 : index
    %c0_3 = arith.constant 0 : index
    %1 = vector.load %arg2[%c0_1, %c0_2, %c0_3] : memref<1x16x128xf32, #tpu.memory_space<vmem>>, vector<1x16x128xf32>
    %2 = vector.shape_cast %1 : vector<1x16x128xf32> to vector<16x128xf32>
    %cst = arith.constant dense<0.000000e+00> : vector<32x128xf32>
    %3 = tpu.matmul %0, %2, %cst {dimension_numbers = #tpu.dot_dimension_numbers<[1], [0], [0], [1], [0, 0, 1, 1], [], []>} : vector<32x16xf32>, vector<16x128xf32>, vector<32x128xf32> -> vector<32x128xf32>
    %c0_4 = arith.constant 0 : index
    %c0_5 = arith.constant 0 : index
    %4 = vector.load %arg4[%c0_4, %c0_5] : memref<32x1xf32, #tpu.memory_space<vmem>>, vector<32x1xf32>
    %5 = vector.broadcast %4 : vector<32x1xf32> to vector<32x128xf32>
    %6 = arith.addf %3, %5 : vector<32x128xf32>
    %cst_6 = arith.constant 0.000000e+00 : f32
    %7 = vector.broadcast %cst_6 : f32 to vector<32x128xf32>
    %8 = arith.maximumf %6, %7 : vector<32x128xf32>
    %c0_7 = arith.constant 0 : index
    %c0_8 = arith.constant 0 : index
    %9 = vector.load %arg5[%c0_7, %c0_8] : memref<64x32xf32, #tpu.memory_space<vmem>>, vector<64x32xf32>
    %cst_9 = arith.constant dense<0.000000e+00> : vector<64x128xf32>
    %10 = tpu.matmul %9, %8, %cst_9 {dimension_numbers = #tpu.dot_dimension_numbers<[1], [0], [0], [1], [0, 0, 1, 1], [], []>} : vector<64x32xf32>, vector<32x128xf32>, vector<64x128xf32> -> vector<64x128xf32>
    %c0_10 = arith.constant 0 : index
    %c0_11 = arith.constant 0 : index
    %11 = vector.load %arg6[%c0_10, %c0_11] : memref<64x1xf32, #tpu.memory_space<vmem>>, vector<64x1xf32>
    %12 = vector.broadcast %11 : vector<64x1xf32> to vector<64x128xf32>
    %13 = arith.addf %10, %12 : vector<64x128xf32>
    %c0_12 = arith.constant 0 : index
    %c0_13 = arith.constant 0 : index
    %c0_14 = arith.constant 0 : index
    %14 = vector.load %arg7[%c0_12, %c0_13, %c0_14] : memref<1x64x128xf32, #tpu.memory_space<vmem>>, vector<1x64x128xf32>
    %15 = vector.shape_cast %14 : vector<1x64x128xf32> to vector<64x128xf32>
    %16 = vector.shape_cast %13 : vector<64x128xf32> to vector<1x64x128xf32>
    tpu.vector_store %arg7[%c0_12, %c0_13, %c0_14], %16 {strides = array<i32>} : memref<1x64x128xf32, #tpu.memory_space<vmem>>, vector<1x64x128xf32>,
    return
  }
  func.func @transform_0(%arg0: i32, %arg1: i32) -> (i32, i32, i32) {
    %c0_i32 = arith.constant 0 : i32
    %c0_i32_0 = arith.constant 0 : i32
    return %arg0, %c0_i32, %arg1 : i32, i32, i32
  }
  func.func @transform_1(%arg0: i32, %arg1: i32) -> (i32, i32) {
    %c0_i32 = arith.constant 0 : i32
    %c0_i32_0 = arith.constant 0 : i32
    %c0_i32_1 = arith.constant 0 : i32
    return %c0_i32, %c0_i32_0 : i32, i32
  }
  func.func @transform_2(%arg0: i32, %arg1: i32) -> (i32, i32) {
    %c0_i32 = arith.constant 0 : i32
    %c0_i32_0 = arith.constant 0 : i32
    %c0_i32_1 = arith.constant 0 : i32
    return %c0_i32, %c0_i32_0 : i32, i32
  }
  func.func @transform_3(%arg0: i32, %arg1: i32) -> (i32, i32) {
    %c0_i32 = arith.constant 0 : i32
    %c0_i32_0 = arith.constant 0 : i32
    %c0_i32_1 = arith.constant 0 : i32
    return %c0_i32, %c0_i32_0 : i32, i32
  }
  func.func @transform_4(%arg0: i32, %arg1: i32) -> (i32, i32) {
    %c0_i32 = arith.constant 0 : i32
    %c0_i32_0 = arith.constant 0 : i32
    %c0_i32_1 = arith.constant 0 : i32
    return %c0_i32, %c0_i32_0 : i32, i32
  }
  func.func @transform_5(%arg0: i32, %arg1: i32) -> (i32, i32, i32) {
    %c0_i32 = arith.constant 0 : i32
    %c0_i32_0 = arith.constant 0 : i32
    return %arg0, %c0_i32, %arg1 : i32, i32, i32
  }
}

</mosaic_0001>

<bundles_post_ra>
// kernel: encoder_forward.1
= control target key start
LH: loop header
LB: loop body
LE: loop exit
PB: predicated region body
PF: predicated region fallthrough
CT: control target
= control target key end

     0   :  { %s828_s18 = smov 0   ;;  %s830_s19 = smov 0   ;;  %s949_s0 = inlined_call_operand.vmem [shape: f32[2,16,128], index: 0, kind: input, shape index: {}]   ;;  %s950_s1 = inlined_call_operand.vmem [shape: f32[32,16], index: 1, kind: input, shape index: {}]   ;;  %s951_s2 = inlined_call_operand.vmem [shape: f32[32,1], index: 2, kind: input, shape index: {}]   ;;  %s952_s3 = inlined_call_operand.vmem [shape: f32[64,32], index: 3, kind: input, shape index: {}]   ;;  %s953_s4 = inlined_call_operand.vmem [shape: f32[64,1], index: 4, kind: input, shape index: {}]   ;;  %s954_s5 = inlined_call_operand.vmem [shape: f32[2,64,128], index: 5, kind: output, shape index: {}]  }
   0x1   :  { %s832_s20 = smov 0  }
   0x2 LB: > { %s27_s21 = sadd.s32 1, %s791_s19  ;;  %p669_p0 = scmp.ge.s32.totalorder %s795_s20, 1  ;;  %s795_s20 = sphi %s832_s20, %s15_s20   ;;  %s791_s19 = sphi %s830_s19, %s956_s19   ;;  %s787_s18 = sphi %s828_s18, %s955_s18  }
   0x3   : > { %p29_p1 = scmp.ge.s32.totalorder %s27_s21, 2  ;;  %p206_p2 = scmp.lt.s32.totalorder %s795_s20, 3 }
   0x5   : > { %s958_s21 = smov (%p29_p1, %s27_s21), 0  ;;  %p207_p3 = pnand %p669_p0, %p206_p2 }
   0x6   : > { %p240_p4 = scmp.lt.s32.totalorder (!%p207_p3), %s787_s18, 1 }
   0x7   : > { %210 = sbr.rel (%p207_p3) target bundleno = 435 (0x1b3), region = 40 }
   0xc   : > { %v256_v0 = vld [vmem:[%s950_s1] sm:$0xff]  ;;  %vm286_vm0 = vcmask 130048   ;;  %v797_v1 = vmov 0   ;;  %v265_v2 = vld [vmem:[%s951_s2 + $0x18] sm:$0xff]  ;;  %s960_s18 = smov (!%p240_p4, %s787_s18), 1  ;;  %v263_v3 = vld [vmem:[%s951_s2 + $0x8] sm:$0xff] }
   0xd   : > { %712 = vmatprep.mubr.msk.f32.mxu0 %vm286_vm0, %v256_v0  ;;  %771 = vset.pattern.permute.xlu0 %v797_v1  ;;  %v264_v4 = vld [vmem:[%s951_s2 + $0x10] sm:$0xff]  ;;  %s688_s30 = sshll.u32 %s960_s18, 4  ;;  %v262_v5 = vld [vmem:[%s951_s2] sm:$0xff]  ;;  %v257_v9 = vld [vmem:[%s950_s1 + $0x8] sm:$0xff]  ;;  %vm444_vm1 = vcmask 261120   ;;  %s689_s7 = sshll.u32 %s960_s18, 6 }
   0xe   : > { %283 = vperm.xlu0 %771, %v265_v2   ;;  %772 = vset.pattern.permute.xlu1 %v797_v1  ;;  %s247_s10 = scalar_lea.vmem %s949_s0, %s688_s30  ;;  %v396_v8 = vld [vmem:[%s953_s4] sm:$0xff]  ;;  %v397_v10 = vld [vmem:[%s953_s4 + $0x8] sm:$0xff]  ;;  %v258_v11 = vld [vmem:[%s950_s1 + $0x10] sm:$0xff] }
   0xf   : > { %273 = vperm.xlu1 %772, %v263_v3   ;;  %v261_v6 = vld [vmem:[%s247_s10 + $0x8] sm:$0xff]  ;;  %v260_v7 = vld [vmem:[%s247_s10] sm:$0xff]  ;;  %v398_v12 = vld [vmem:[%s953_s4 + $0x10] sm:$0xff]  ;;  %s255_s10 = scalar_lea.vmem %s954_s5, %s689_s7 }
  0x10   : > { %708 = vmatprep.subr.mxu0 %v261_v6  ;;  %v259_v13 = vld [vmem:[%s950_s1 + $0x18] sm:$0xff]  ;;  %v400_v15 = vld [vmem:[%s953_s4 + $0x20] sm:$0xff]  ;;  %v401_v16 = vld [vmem:[%s953_s4 + $0x28] sm:$0xff] }
  0x11   : > { %709 = vmatpush3.msra.mxu0 %v261_v6  ;;  %v399_v14 = vld [vmem:[%s953_s4 + $0x18] sm:$0xff]  ;;  %v402_v17 = vld [vmem:[%s953_s4 + $0x30] sm:$0xff]  ;;  %v388_v19 = vld [vmem:[%s952_s3] sm:$0xff] }
  0x12   : > { %278 = vperm.xlu0 %771, %v264_v4   ;;  %710 = vmatprep.subr.mxu0 %v260_v7  ;;  %v403_v18 = vld [vmem:[%s953_s4 + $0x38] sm:$0xff]  ;;  %v390_v20 = vld [vmem:[%s952_s3 + $0x10] sm:$0xff]  ;;  %v389_v37 = vld [vmem:[%s952_s3 + $0x8] sm:$0xff] }
  0x13   : > { %268 = vperm.xlu1 %772, %v262_v5   ;;  %711 = vmatpush3.msra.mxu0 %v260_v7  ;;  %v391_v38 = vld [vmem:[%s952_s3 + $0x18] sm:$0xff]  ;;  %v392_v39 = vld [vmem:[%s952_s3 + $0x20] sm:$0xff]  ;;  %v393_v40 = vld [vmem:[%s952_s3 + $0x28] sm:$0xff] }
  0x14   : > { %713 = vmatmul.mubr.msk.f32.vlgmr.msra.gmra.mxu0 %vm286_vm0, %v257_v9  ;;  %729 = vmatprep.mubr.msk.f32.mxu1 %vm444_vm1, %v390_v20  ;;  %v394_v41 = vld [vmem:[%s952_s3 + $0x30] sm:$0xff]  ;;  %v395_v42 = vld [vmem:[%s952_s3 + $0x38] sm:$0xff] }
  0x15   : > { %715 = vmatprep.mubr.msk.f32.mxu0 %vm286_vm0, %v258_v11 }
  0x16   : > { %406 = vperm.xlu0 %771, %v396_v8  }
  0x17   : > { %411 = vperm.xlu1 %772, %v397_v10  }
  0x18   : > { %716 = vmatmul.mubr.msk.f32.gmra.mxu0 %vm286_vm0, %v259_v13 }
  0x19   : > { %726 = vmatprep.mubr.msk.f32.mxu0 %vm444_vm1, %v388_v19 }
  0x1a   : > { %416 = vperm.xlu0 %771, %v398_v12  }
  0x1b   : > { %421 = vperm.xlu1 %772, %v399_v14  }
  0x1e   : > { %426 = vperm.xlu0 %771, %v400_v15  }
  0x1f   : > { %431 = vperm.xlu1 %772, %v401_v16  }
  0x22   : > { %436 = vperm.xlu0 %771, %v402_v17  }
  0x23   : > { %441 = vperm.xlu1 %772, %v403_v18  }
  0x89   : > { %v284_v21 = vpop.permute.xlu0 %283 }
  0x8a   : > { %v274_v23 = vpop.permute.xlu1 %273 }
  0x8d   : > { %v279_v27 = vpop.permute.xlu0 %278 }
  0x8e   : > { %v269_v32 = vpop.permute.xlu1 %268 }
  0x91   : > { %v407_v44 = vpop.permute.xlu0 %406 }
  0x92   : > { %v412_v43 = vpop.permute.xlu1 %411 }
  0x95   : > { %v417_v46 = vpop.permute.xlu0 %416 }
  0x96   : > { %v422_v45 = vpop.permute.xlu1 %421 }
  0x99   : > { %v427_v56 = vpop.permute.xlu0 %426 }
  0x9a   : > { %v432_v49 = vpop.permute.xlu1 %431 }
  0x9d   : > { %v437_v0 = vpop.permute.xlu0 %436 }
  0x9e   : > { %v442_v61 = vpop.permute.xlu1 %441 }
  0xd4   : > { %v714_v22 = vpop.f32.mrf.mxu0 }
  0xd5   : > { %v371_v29 = vadd.f32 %v714_v22, %v274_v23 }
  0xd6   : > { %v365_v24 = vpop.f32.mrf.mxu0 }
  0xd7   : > { %v366_v33 = vadd.f32 %v365_v24, %v269_v32  ;;  %v385_v35 = vmax.f32 %v371_v29, 0.0 }
  0xd8   : > { %v717_v25 = vpop.f32.mrf.mxu0 }
  0xd9   : > { %v381_v26 = vadd.f32 %v717_v25, %v284_v21  ;;  %v384_v36 = vmax.f32 %v366_v33, 0.0 }
  0xda   : > { %v375_v28 = vpop.f32.mrf.mxu0 }
  0xdb   : > { %v387_v30 = vmax.f32 %v381_v26, 0.0  ;;  %v376_v31 = vadd.f32 %v375_v28, %v279_v27 }
  0xdd   : > { %v386_v34 = vmax.f32 %v376_v31, 0.0  ;;  %718 = vmatprep.subr.mxu0 %v387_v30  ;;  %738 = vmatprep.subr.mxu1 %v387_v30 }
  0xde   : > { %719 = vmatpush3.msra.mxu0 %v387_v30  ;;  %742 = vmatpush3.msra.mxu1 %v387_v30 }
  0xdf   : > { %720 = vmatprep.subr.mxu0 %v386_v34  ;;  %739 = vmatprep.subr.mxu1 %v386_v34 }
  0xe0   : > { %721 = vmatpush3.msra.mxu0 %v386_v34  ;;  %743 = vmatpush3.msra.mxu1 %v386_v34 }
  0xe1   : > { %722 = vmatprep.subr.mxu0 %v385_v35  ;;  %740 = vmatprep.subr.mxu1 %v385_v35 }
  0xe2   : > { %723 = vmatpush3.msra.mxu0 %v385_v35  ;;  %744 = vmatpush3.msra.mxu1 %v385_v35 }
  0xe3   : > { %724 = vmatprep.subr.mxu0 %v384_v36  ;;  %741 = vmatprep.subr.mxu1 %v384_v36 }
  0xe4   : > { %725 = vmatpush3.msra.mxu0 %v384_v36  ;;  %745 = vmatpush3.msra.mxu1 %v384_v36 }
  0xe5   : > { %727 = vmatmul.mubr.msk.f32.vlgmr.msra.gmra.mxu0 %vm444_vm1, %v389_v37  ;;  %730 = vmatmul.mubr.msk.f32.vlgmr.msra.gmra.mxu1 %vm444_vm1, %v391_v38 }
  0xe6   : > { %732 = vmatprep.mubr.msk.f32.mxu1 %vm444_vm1, %v392_v39 }
  0xe9   : > { %733 = vmatmul.mubr.msk.f32.gmra.mxu1 %vm444_vm1, %v393_v40 }
  0xea   : > { %735 = vmatprep.mubr.msk.f32.mxu1 %vm444_vm1, %v394_v41 }
  0xed   : > { %736 = vmatmul.mubr.msk.f32.gmra.mxu1 %vm444_vm1, %v395_v42 }
 0x1a5   : > { %v728_v47 = vpop.f32.mrf.mxu0  ;;  %v731_v48 = vpop.f32.mrf.mxu1 }
 0x1a6   : > { %v541_v50 = vadd.f32 %v728_v47, %v412_v43  ;;  %v551_v51 = vadd.f32 %v731_v48, %v422_v45 }
 0x1a7   : > { %v535_v52 = vpop.f32.mrf.mxu0  ;;  %v545_v53 = vpop.f32.mrf.mxu1 }
 0x1a8   : > { %575 = vst [vmem:[%s255_s10 + $0x8] sm:$0xff] %v541_v50  ;;  %577 = vst [vmem:[%s255_s10 + $0x18] sm:$0xff] %v551_v51  ;;  %v536_v54 = vadd.f32 %v535_v52, %v407_v44  ;;  %v546_v55 = vadd.f32 %v545_v53, %v417_v46 }
 0x1a9   : > { %v734_v57 = vpop.f32.mrf.mxu1 }
 0x1aa   : > { %574 = vst [vmem:[%s255_s10] sm:$0xff] %v536_v54  ;;  %576 = vst [vmem:[%s255_s10 + $0x10] sm:$0xff] %v546_v55  ;;  %v561_v58 = vadd.f32 %v734_v57, %v432_v49 }
 0x1ab   : > { %v555_v59 = vpop.f32.mrf.mxu1 }
 0x1ac   : > { %579 = vst [vmem:[%s255_s10 + $0x28] sm:$0xff] %v561_v58  ;;  %v556_v60 = vadd.f32 %v555_v59, %v427_v56 }
 0x1ad   : > { %v737_v62 = vpop.f32.mrf.mxu1 }
 0x1ae   : > { %578 = vst [vmem:[%s255_s10 + $0x20] sm:$0xff] %v556_v60  ;;  %v571_v63 = vadd.f32 %v737_v62, %v442_v61 }
 0x1af   : > { %v565_v1 = vpop.f32.mrf.mxu1 }
 0x1b0   : > { %581 = vst [vmem:[%s255_s10 + $0x38] sm:$0xff] %v571_v63  ;;  %v566_v2 = vadd.f32 %v565_v1, %v437_v0 }
 0x1b2   : > { %580 = vst [vmem:[%s255_s10 + $0x30] sm:$0xff] %v566_v2 }
 0x1b3 PF: > { %s15_s20 = sadd.s32 1, %s795_s20   ;;  %s955_s18 = smov %s791_s19 }
 0x1b4   : > { %p12_p5 = scmp.ge.s32.totalorder %s15_s20, 4   ;;  %s956_s19 = smov %s958_s21 }
 0x1b6   :  { %14 = sbr.rel (!%p12_p5) target bundleno = 2 (0x2), region = 70 }

</bundles_post_ra>
